<compile_context>
chip_gen: v6e
topology: v6e:2x2x1
jax: 0.10.0
libtpu: 0.0.40
codegen_flags: <defaults>
</compile_context>

<pallas_src>
import math
from functools import partial

import jax
import jax.numpy as jnp
from jax import lax
from jax.experimental import pallas as pl
from jax.experimental.pallas import tpu as pltpu


_GELU_C = 0.7978845608028654          # sqrt(2 / pi)
_LN_EPS = 1e-6
_DN_LAST = (((1,), (1,)), ((), ()))   # dot_general: contract last dims, no batch dims


def _round_up(x, m):
    return ((x + m - 1) // m) * m


def _choose_tile_m(m, preferred=256):
    # Row tile for M-tiled kernels; wrappers pad M up to a multiple of it, so we never
    # fall back to a single huge (M, ...) block (no pipelining / VMEM blowups).
    return min(preferred, _round_up(m, 8))


def _pad_rows(x, tile):
    m = x.shape[0]
    mp = _round_up(m, tile)
    if mp == m:
        return x
    return jnp.pad(x, ((0, mp - m), (0, 0)))


def _pick_seq_tile(L, preferred=256):
    if L <= preferred or L % preferred != 0:
        return L
    return preferred


def _layernorm(x, g, b):
    # BERT-pytorch LayerNorm: a2 * (x - mean) / (std_unbiased + eps) + b2
    n = x.shape[-1]
    mean = jnp.mean(x, axis=-1, keepdims=True)
    d = x - mean
    var = jnp.sum(d * d, axis=-1, keepdims=True) * (1.0 / (n - 1))
    std = jnp.sqrt(var)
    return g * d * pl.reciprocal(std + _LN_EPS, approx=False) + b


# ----------------------- generic tiled linear (path preprocessing) ------------------

def _linear_kernel(x_ref, w_ref, b_ref, o_ref):
    o_ref[...] = (jnp.dot(x_ref[...], w_ref[...], preferred_element_type=jnp.float32)
                  + b_ref[...])


def linear(x2d, w, b, tile_m=256):
    M, K = x2d.shape
    N = w.shape[1]
    tm = _choose_tile_m(M, tile_m)
    xp = _pad_rows(x2d, tm)
    Mp = xp.shape[0]
    out = pl.pallas_call(
        _linear_kernel,
        out_shape=jax.ShapeDtypeStruct((Mp, N), jnp.float32),
        grid=(Mp // tm,),
        in_specs=[pl.BlockSpec((tm, K), lambda i: (i, 0)),
                  pl.BlockSpec((K, N), lambda i: (0, 0)),
                  pl.BlockSpec((1, N), lambda i: (0, 0))],
        out_specs=pl.BlockSpec((tm, N), lambda i: (i, 0)),
        compiler_params=pltpu.CompilerParams(dimension_semantics=("parallel",)),
    )(xp, w, b.reshape(1, N))
    return out[:M] if Mp != M else out


# ----------------------- absolute-path bias: apk @ apq^T per batch ------------------

def _ap_outer_kernel(k_ref, q_ref, o_ref):
    # ap[b, l, m] = sum_c apk[b, l, c] * apq[b, m, c]   (einsum 'abc,adc->abd')
    k = k_ref[0].astype(jnp.bfloat16)
    q = q_ref[0].astype(jnp.bfloat16)
    o_ref[0] = lax.dot_general(k, q, _DN_LAST,
                               preferred_element_type=jnp.float32).astype(o_ref.dtype)


def ap_outer(apk, apq):
    B, L, dk = apk.shape
    return pl.pallas_call(
        _ap_outer_kernel,
        out_shape=jax.ShapeDtypeStruct((B, L, L), jnp.bfloat16),   # bf16 bias in HBM
        grid=(B,),
        in_specs=[pl.BlockSpec((1, L, dk), lambda b: (b, 0, 0)),
                  pl.BlockSpec((1, L, dk), lambda b: (b, 0, 0))],
        out_specs=pl.BlockSpec((1, L, L), lambda b: (b, 0, 0)),
        compiler_params=pltpu.CompilerParams(dimension_semantics=("parallel",)),
    )(apk, apq)


# ----------------------- fused LayerNorm + QKV projection --------------------------

def _ln_qkv_kernel(x_ref, g_ref, b_ref, wq_ref, bq_ref, wkv_ref, bkv_ref,
                   oq_ref, okv_ref):
    xn = _layernorm(x_ref[...], g_ref[...], b_ref[...]).astype(jnp.bfloat16)
    oq_ref[...] = (jnp.dot(xn, wq_ref[...], preferred_element_type=jnp.float32)
                   + bq_ref[...]).astype(oq_ref.dtype)
    okv_ref[...] = (jnp.dot(xn, wkv_ref[...], preferred_element_type=jnp.float32)
                    + bkv_ref[...]).astype(okv_ref.dtype)


def ln_qkv(x2d, gamma, beta, wq, bq, wkv, bkv, tile_m=256):
    M, H = x2d.shape
    tm = _choose_tile_m(M, tile_m)
    xp = _pad_rows(x2d, tm)
    Mp = xp.shape[0]
    q, kv = pl.pallas_call(
        _ln_qkv_kernel,
        out_shape=(jax.ShapeDtypeStruct((Mp, H), jnp.bfloat16),
                   jax.ShapeDtypeStruct((Mp, 2 * H), jnp.bfloat16)),
        grid=(Mp // tm,),
        in_specs=[pl.BlockSpec((tm, H), lambda i: (i, 0)),
                  pl.BlockSpec((1, H), lambda i: (0, 0)),
                  pl.BlockSpec((1, H), lambda i: (0, 0)),
                  pl.BlockSpec((H, H), lambda i: (0, 0)),
                  pl.BlockSpec((1, H), lambda i: (0, 0)),
                  pl.BlockSpec((H, 2 * H), lambda i: (0, 0)),
                  pl.BlockSpec((1, 2 * H), lambda i: (0, 0))],
        out_specs=(pl.BlockSpec((tm, H), lambda i: (i, 0)),
                   pl.BlockSpec((tm, 2 * H), lambda i: (i, 0))),
        compiler_params=pltpu.CompilerParams(dimension_semantics=("parallel",)),
    )(xp, gamma.reshape(1, H), beta.reshape(1, H),
      wq, bq.reshape(1, H), wkv, bkv.reshape(1, 2 * H))
    if Mp != M:
        q, kv = q[:M], kv[:M]
    return q, kv


# ----------------------- path-relative multi-head attention ------------------------

def _attention_kernel(q_ref, kv_ref, mask_ref, pm_ref, rk_ref, rv_ref, ap_ref, o_ref,
                      *, nh, d_k, P):
    qh = q_ref[0]                                   # (tq, H)   bf16
    kv = kv_ref[0]                                  # (L, 2H)   bf16
    inv_mask = mask_ref[0] == 0.0                   # (tq, L)   bool
    pm = pm_ref[0]                                  # (tq, L)   int32
    rk = rk_ref[0].astype(jnp.bfloat16)             # (P, d_k)  shared across heads
    rv = rv_ref[0].astype(jnp.bfloat16)             # (P, d_k)  shared across heads
    ap = ap_ref[0].astype(jnp.float32)              # (tq, L)   shared across heads

    L = kv.shape[0]
    H = nh * d_k
    scale = 1.0 / math.sqrt(d_k)
    neg_inf = jnp.float32(-1e9)

    for h in range(nh):                             # static unroll over heads
        q = qh[:, h * d_k:(h + 1) * d_k]            # (tq, d_k)
        k = kv[:, h * d_k:(h + 1) * d_k]            # (L,  d_k)
        v = kv[:, H + h * d_k:H + (h + 1) * d_k]    # (L,  d_k)

        # fused scores: q @ [k | r_k]^T  -> (tq, L) QK scores and (tq, P) rel scores
        k_cat = jnp.concatenate([k, rk], axis=0)                      # (L+P, d_k)
        s_cat = lax.dot_general(q, k_cat, _DN_LAST,
                                preferred_element_type=jnp.float32)   # (tq, L+P)
        qk = s_cat[:, :L]
        r_sc = s_cat[:, L:]

        # gather(Q r_k^T, path_map) without any (L,L,P) one-hot: P-step select-accumulate
        rel = jnp.zeros_like(qk)
        for p_idx in range(P):
            rel = rel + jnp.where(pm == p_idx, r_sc[:, p_idx:p_idx + 1], 0.0)

        scores = (qk + rel + ap) * scale
        scores = jnp.where(inv_mask, neg_inf, scores)

        m = jnp.max(scores, axis=-1, keepdims=True)
        e = jnp.exp(scores - m)
        probs = e * pl.reciprocal(jnp.sum(e, axis=-1, keepdims=True), approx=False)

        # scatter_add(P, path_map) -> (tq, P) without a one-hot: P-step select-reduce
        cols = [jnp.sum(jnp.where(pm == p_idx, probs, 0.0), axis=-1, keepdims=True)
                for p_idx in range(P)]
        attn_p = jnp.concatenate(cols, axis=-1)                       # (tq, P)

        # fused output: [probs | attn_p] @ [v | r_v]
        pv = jnp.concatenate([probs, attn_p], axis=-1).astype(jnp.bfloat16)   # (tq, L+P)
        v_cat = jnp.concatenate([v, rv], axis=0)                              # (L+P, d_k)
        out_h = jnp.dot(pv, v_cat, preferred_element_type=jnp.float32)        # (tq, d_k)

        # direct slice store (no outs list / concat); HBM writeback stays lane-dense (tq,H)
        o_ref[0, :, h * d_k:(h + 1) * d_k] = out_h.astype(o_ref.dtype)


def attention(q3, kv3, mask_sq, path_map, r_k, r_v, ap, *, nh, d_k, tile_q=256):
    B, L, H = q3.shape
    P = r_k.shape[1]
    tq = _pick_seq_tile(L, tile_q)
    nq = L // tq
    return pl.pallas_call(
        partial(_attention_kernel, nh=nh, d_k=d_k, P=P),
        out_shape=jax.ShapeDtypeStruct((B, L, H), jnp.bfloat16),
        grid=(B, nq),
        in_specs=[
            pl.BlockSpec((1, tq, H), lambda b, qi: (b, qi, 0)),       # Q tile
            pl.BlockSpec((1, L, 2 * H), lambda b, qi: (b, 0, 0)),     # full K|V (resident per b)
            pl.BlockSpec((1, tq, L), lambda b, qi: (b, qi, 0)),       # mask rows
            pl.BlockSpec((1, tq, L), lambda b, qi: (b, qi, 0)),       # path_map rows (int32)
            pl.BlockSpec((1, P, d_k), lambda b, qi: (b, 0, 0)),       # r_k (no head bcast)
            pl.BlockSpec((1, P, d_k), lambda b, qi: (b, 0, 0)),       # r_v (no head bcast)
            pl.BlockSpec((1, tq, L), lambda b, qi: (b, qi, 0)),       # ap rows (bf16)
        ],
        out_specs=pl.BlockSpec((1, tq, H), lambda b, qi: (b, qi, 0)),
        compiler_params=pltpu.CompilerParams(
            dimension_semantics=("parallel", "parallel")),
    )(q3, kv3, mask_sq, path_map, r_k, r_v, ap)


# ------------- fused: out-proj + residual + LayerNorm2 + FFN + residual -------------

def _proj_ffn_kernel(x_ref, a_ref, wo_ref, bo_ref, g2_ref, b2_ref,
                     w1_ref, b1_ref, w2_ref, b2f_ref, o_ref):
    x = x_ref[...]                                                          # (TM, H) f32
    x2 = x + (jnp.dot(a_ref[...], wo_ref[...], preferred_element_type=jnp.float32)
              + bo_ref[...])                                                # residual 1
    xn = _layernorm(x2, g2_ref[...], b2_ref[...]).astype(jnp.bfloat16)
    h = jnp.dot(xn, w1_ref[...], preferred_element_type=jnp.float32) + b1_ref[...]
    g = 0.5 * h * (1.0 + jnp.tanh(_GELU_C * (h + 0.044715 * h * h * h)))    # BERT GELU
    o_ref[...] = x2 + (jnp.dot(g.astype(jnp.bfloat16), w2_ref[...],
                               preferred_element_type=jnp.float32)
                       + b2f_ref[...])                                      # residual 2


def proj_ffn(x2d, a2d, wo, bo, g2, b2, w1, b1, w2, b2f, tile_m=256):
    M, H = x2d.shape
    FF = w1.shape[1]
    tm = _choose_tile_m(M, tile_m)
    xp = _pad_rows(x2d, tm)
    apad = _pad_rows(a2d, tm)
    Mp = xp.shape[0]
    out = pl.pallas_call(
        _proj_ffn_kernel,
        out_shape=jax.ShapeDtypeStruct((Mp, H), jnp.float32),
        grid=(Mp // tm,),
        in_specs=[pl.BlockSpec((tm, H), lambda i: (i, 0)),     # x (residual, f32)
                  pl.BlockSpec((tm, H), lambda i: (i, 0)),     # attention output (bf16)
                  pl.BlockSpec((H, H), lambda i: (0, 0)),
                  pl.BlockSpec((1, H), lambda i: (0, 0)),
                  pl.BlockSpec((1, H), lambda i: (0, 0)),
                  pl.BlockSpec((1, H), lambda i: (0, 0)),
                  pl.BlockSpec((H, FF), lambda i: (0, 0)),
                  pl.BlockSpec((1, FF), lambda i: (0, 0)),
                  pl.BlockSpec((FF, H), lambda i: (0, 0)),
                  pl.BlockSpec((1, H), lambda i: (0, 0))],
        out_specs=pl.BlockSpec((tm, H), lambda i: (i, 0)),
        compiler_params=pltpu.CompilerParams(dimension_semantics=("parallel",)),
    )(xp, apad, wo, bo.reshape(1, H), g2.reshape(1, H), b2.reshape(1, H),
      w1, b1.reshape(1, FF), w2, b2f.reshape(1, H))
    return out[:M] if Mp != M else out


# --------------------------------- parameters ---------------------------------------

def init_params(key, args):
    H = args["hidden"]
    nh = args["attn_heads"]
    dk = H // nh
    FF = 4 * H

    def lin(k, fan_in, fan_out, scale=0.05):
        kw, kb = jax.random.split(k)
        return {"w": scale * jax.random.normal(kw, (fan_in, fan_out), jnp.float32),
                "b": 0.01 * jax.random.normal(kb, (fan_out,), jnp.float32)}

    it = iter(jax.random.split(key, 4 * args["layers"] + 2))
    params = {
        "rp_kv": lin(next(it), dk, 2 * dk),    # fused [rp_k | rp_v]
        "ap_kq": lin(next(it), dk, 2 * dk),    # fused [ap_k | ap_q]
        "layers": [],
    }
    for _ in range(args["layers"]):
        params["layers"].append({
            "wqkv": lin(next(it), H, 3 * H),   # fused [Wq | Wk | Wv]
            "wo": lin(next(it), H, H),
            "ff1": lin(next(it), H, FF),
            "ff2": lin(next(it), FF, H),
            "ln1_g": jnp.ones((H,), jnp.float32), "ln1_b": jnp.zeros((H,), jnp.float32),
            "ln2_g": jnp.ones((H,), jnp.float32), "ln2_b": jnp.zeros((H,), jnp.float32),
        })
    return params


# ------------------------------- Encoder forward -------------------------------------

def encoder_forward(params, content, mask, paths, path_map, r_paths_, r_path_idx, args):
    B, L, Hd = content.shape
    nh = args["attn_heads"]
    dk = Hd // nh
    P = paths.shape[1]
    M = B * L

    # --- relative path encodings (relation_path=True, rp_kv=True) ---
    # Linear weights are shared across heads; compute once per (b, p) and share the
    # (B, P, dk) tensors across heads inside the attention kernel (no head broadcast).
    rkv = linear(paths.reshape(B * P, dk),
                 params["rp_kv"]["w"], params["rp_kv"]["b"]).reshape(B, P, 2 * dk)
    r_k = rkv[:, :, :dk]
    r_v = rkv[:, :, dk:]

    # --- absolute path bias (absolute_path=True, ap_kq=True) ---
    # TODO(synk): the padded-row gather is done with XLA take_along_axis (glue), not Pallas.
    r_pad = jnp.concatenate([r_paths_, jnp.zeros((B, 1, dk), r_paths_.dtype)], axis=1)
    idx = jnp.broadcast_to(r_path_idx[:, :, None].astype(jnp.int32), (B, L, dk))
    abs_path = jnp.take_along_axis(r_pad, idx, axis=1)                    # (B, L, dk)
    apkq = linear(abs_path.reshape(B * L, dk),
                  params["ap_kq"]["w"], params["ap_kq"]["b"]).reshape(B, L, 2 * dk)
    ap = ap_outer(apkq[:, :, :dk], apkq[:, :, dk:])                       # (B, L, L) bf16

    mask_sq = mask.reshape(B, L, L).astype(jnp.float32)   # squeeze the head-broadcast dim
    pm = path_map.astype(jnp.int32)
    x = content.astype(jnp.float32)

    for lp in params["layers"]:
        wqkv = lp["wqkv"]["w"].astype(jnp.bfloat16)
        bqkv = lp["wqkv"]["b"]
        # input sublayer: x + Attention(LayerNorm(x))       (dropout == identity)
        q2d, kv2d = ln_qkv(x.reshape(M, Hd), lp["ln1_g"], lp["ln1_b"],
                           wqkv[:, :Hd], bqkv[:Hd], wqkv[:, Hd:], bqkv[Hd:])
        a = attention(q2d.reshape(B, L, Hd), kv2d.reshape(B, L, 2 * Hd),
                      mask_sq, pm, r_k, r_v, ap, nh=nh, d_k=dk)           # (B, L, H) bf16
        # output projection + residual + output sublayer (LN + FFN + residual), fused
        x = proj_ffn(x.reshape(M, Hd), a.reshape(M, Hd),
                     lp["wo"]["w"].astype(jnp.bfloat16), lp["wo"]["b"],
                     lp["ln2_g"], lp["ln2_b"],
                     lp["ff1"]["w"].astype(jnp.bfloat16), lp["ff1"]["b"],
                     lp["ff2"]["w"].astype(jnp.bfloat16), lp["ff2"]["b"]).reshape(B, L, Hd)
        # TransformerBlock trailing dropout: identity (p = 0 / eval mode)
    return x


# ------------------------------------- main ------------------------------------------

if __name__ == "__main__":
    args = dict(layers=2, hidden=32, attn_heads=4, max_code_length=16,
                max_path_num=8, dropout=0.0,
                absolute_path=True, relation_path=True, ap_kq=True, rp_kv=True)
    B = 2
    L = args["max_code_length"]
    Hd = args["hidden"]
    nh = args["attn_heads"]
    dk = Hd // nh
    P = args["max_path_num"]

    key = jax.random.PRNGKey(0)
    kp, kc, kpa, kpm, krp, kri, klen = jax.random.split(key, 7)

    params = init_params(kp, args)

    content = jax.random.normal(kc, (B, L, Hd), jnp.float32)
    paths = jax.random.normal(kpa, (B, P, dk), jnp.float32)
    r_paths_ = jax.random.normal(krp, (B, P, dk), jnp.float32)
    path_map = jax.random.randint(kpm, (B, L, L), 0, P, dtype=jnp.int32)
    r_path_idx = jax.random.randint(kri, (B, L), 0, P + 1, dtype=jnp.int32)  # P == pad row
    lengths = jax.random.randint(klen, (B,), L // 2, L + 1)
    key_mask = (jnp.arange(L)[None, :] < lengths[:, None]).astype(jnp.float32)   # (B, L)
    mask = jnp.broadcast_to(key_mask[:, None, None, :], (B, 1, L, L))

    def fwd(params, content, mask, paths, path_map, r_paths_, r_path_idx):
        return encoder_forward(params, content, mask, paths, path_map,
                               r_paths_, r_path_idx, args)

    out = fwd(params, content, mask, paths, path_map, r_paths_, r_path_idx)
    jax.block_until_ready(out)
    assert out.shape == (B, L, Hd)
    assert bool(jnp.all(jnp.isfinite(out)))
    print("KERNEL_OK")
</pallas_src>

<mosaic_0001>
module attributes {stable_mosaic.version = 11 : i64} {
  func.func @_linear_kernel(%arg0: i32, %arg1: memref<16x8xf32, #tpu.memory_space<vmem>>, %arg2: memref<8x16xf32, #tpu.memory_space<vmem>>, %arg3: memref<1x16xf32, #tpu.memory_space<vmem>>, %arg4: memref<16x16xf32, #tpu.memory_space<vmem>>) attributes {dimension_semantics = [#tpu.dimension_semantics<parallel>], iteration_bounds = array<i64: 1>, scalar_prefetch = 0 : i64, scratch_operands = 0 : i64, tpu.core_type = #tpu.core_type<tc>, window_params = [{transform_indices = @transform_0, window_bounds = array<i64: 16, 8>}, {pipeline_mode = #tpu.pipeline_mode<synchronous>, transform_indices = @transform_1, window_bounds = array<i64: 8, 16>}, {pipeline_mode = #tpu.pipeline_mode<synchronous>, transform_indices = @transform_2, window_bounds = array<i64: 1, 16>}, {transform_indices = @transform_3, window_bounds = array<i64: 16, 16>}]} {
    %c0 = arith.constant 0 : index
    %c0_0 = arith.constant 0 : index
    %0 = vector.load %arg1[%c0, %c0_0] : memref<16x8xf32, #tpu.memory_space<vmem>>, vector<16x8xf32>
    %c0_1 = arith.constant 0 : index
    %c0_2 = arith.constant 0 : index
    %1 = vector.load %arg2[%c0_1, %c0_2] : memref<8x16xf32, #tpu.memory_space<vmem>>, vector<8x16xf32>
    %cst = arith.constant dense<0.000000e+00> : vector<16x16xf32>
    %2 = tpu.matmul %0, %1, %cst {dimension_numbers = #tpu.dot_dimension_numbers<[1], [0], [0], [1], [0, 0, 1, 1], [], []>} : vector<16x8xf32>, vector<8x16xf32>, vector<16x16xf32> -> vector<16x16xf32>
    %c0_3 = arith.constant 0 : index
    %c0_4 = arith.constant 0 : index
    %3 = vector.load %arg3[%c0_3, %c0_4] : memref<1x16xf32, #tpu.memory_space<vmem>>, vector<1x16xf32>
    %4 = vector.broadcast %3 : vector<1x16xf32> to vector<16x16xf32>
    %5 = arith.addf %2, %4 : vector<16x16xf32>
    %c0_5 = arith.constant 0 : index
    %c0_6 = arith.constant 0 : index
    %6 = vector.load %arg4[%c0_5, %c0_6] : memref<16x16xf32, #tpu.memory_space<vmem>>, vector<16x16xf32>
    tpu.vector_store %arg4[%c0_5, %c0_6], %5 {strides = array<i32>} : memref<16x16xf32, #tpu.memory_space<vmem>>, vector<16x16xf32>,
    return
  }
  func.func @transform_0(%arg0: i32) -> (i32, i32) {
    %c0_i32 = arith.constant 0 : i32
    %c0_i32_0 = arith.constant 0 : i32
    return %arg0, %c0_i32 : i32, i32
  }
  func.func @transform_1(%arg0: i32) -> (i32, i32) {
    %c0_i32 = arith.constant 0 : i32
    %c0_i32_0 = arith.constant 0 : i32
    %c0_i32_1 = arith.constant 0 : i32
    return %c0_i32, %c0_i32_0 : i32, i32
  }
  func.func @transform_2(%arg0: i32) -> (i32, i32) {
    %c0_i32 = arith.constant 0 : i32
    %c0_i32_0 = arith.constant 0 : i32
    %c0_i32_1 = arith.constant 0 : i32
    return %c0_i32, %c0_i32_0 : i32, i32
  }
  func.func @transform_3(%arg0: i32) -> (i32, i32) {
    %c0_i32 = arith.constant 0 : i32
    %c0_i32_0 = arith.constant 0 : i32
    return %arg0, %c0_i32 : i32, i32
  }
}

</mosaic_0001>

<bundles_post_ra>
// kernel: tpu_custom_call.1
= control target key start
LH: loop header
LB: loop body
LE: loop exit
PB: predicated region body
PF: predicated region fallthrough
CT: control target
= control target key end

     0   :  { %vm25_vm0 = vcmask 64512   ;;  %s200_s0 = inlined_call_operand.vmem [shape: f32[16,8], index: 0, kind: input, shape index: {}]   ;;  %s201_s1 = inlined_call_operand.vmem [shape: f32[8,16], index: 1, kind: input, shape index: {}]   ;;  %s202_s2 = inlined_call_operand.vmem [shape: f32[1,16], index: 2, kind: input, shape index: {}]   ;;  %s203_s3 = inlined_call_operand.hbm [shape: f32[16,16], index: 3, kind: output, shape index: {}]  }
   0x1   :  { %v17_v0 = vld [vmem:[%s201_s1] sm:$0xff]  ;;  %v16_v2 = vld [vmem:[%s200_s0 + $0x8] sm:$0xff] }
   0x2   :  { %v15_v1 = vld [vmem:[%s200_s0] sm:$0xff]  ;;  %132 = vmatprep.subr.mxu0 %v17_v0 }
   0x3   :  { %134 = vmatprep.mubr.msk.f32.mxu0 %vm25_vm0, %v15_v1 }
   0x4   :  { %8 = vsyncpa [#allocation3], 0  ;;  %133 = vmatpush3.msra.mxu0 %v17_v0  ;;  %v126_v3 = vld [vmem:[%s202_s2] ss:$0 sm:$0xff]  ;;  %s162_s20 = smov [#allocation2]   ;;  %vm107_vm1 = vcmask 130048  }
   0x5   :  { %135 = vmatmul.mubr.msk.f32.vlgmr.msra.gmra.mxu0 %vm25_vm0, %v16_v2  ;;  %s115_s1 = sshll.u32 %s162_s20, 4  ;;  %s116_s1 = int_to_ptr.vmem [resolvable:$true] %s115_s1 }
   0x6   :  { %s140_s0 = scalar_lea.vmem %s116_s1, 256  ;;  %p145_p1 = scmp.lt.s32.totalorder %s116_s1, %s116_s1 }
   0x7   :  { %p141_p0 = scmp.ne.s32.totalorder %s116_s1, %s140_s0  ;;  %p146_p2 = scmp.lt.s32.totalorder %s140_s0, %s140_s0 }
   0x9   :  { %p147_p3 = por %p146_p2, %p145_p1 }
   0xb   :  { %p148_p4 = pnand %p147_p3, %p141_p0 }
  0xc5   :  { %v136_v4 = vpop.f32.mrf.mxu0 }
  0xc6   :  { %v104_v5 = vadd.f32 %v136_v4, %v126_v3 }
  0xc7   :  { %v98_v6 = vpop.f32.mrf.mxu0 }
  0xc8   :  { %109 = vst.msk [vmem:[#allocation2 + $0x8] sm:$0xff] %vm107_vm1, %v104_v5  ;;  %v99_v7 = vadd.f32 %v126_v3, %v98_v6 }
  0xca   :  { %108 = vst.msk [vmem:[#allocation2] sm:$0xff] %vm107_vm1, %v99_v7 }
  0xcb   :  { %151 = shalt.err (!%p148_p4)
}
  0xcc   :  { %s163_s21 = smov 128   ;;  %s164_s22 = smov 8  }
  0xcd   :  { %121 = dma.vmem_to_hbm [thread:$0]  %s116_s1, 256, %s203_s3, [#allocation3], %s163_s21, %s163_s21, %s164_s22  }
  0xce   :  { %160 = dma.done.wait [#allocation3], 256  }
  0xcf   :  { %161 = vsyncadd [#allocation3], 4294967040 }
  0xd0   :  { %125 = vsyncpa [#allocation3], 1 }

</bundles_post_ra>
